<compile_context>
chip_gen: v7x
topology: tpu7x:2x2x1
jax: 0.10.0
libtpu: 0.0.40
codegen_flags: <defaults>
</compile_context>

<pallas_src>
import functools

import jax
import jax.numpy as jnp
from jax.experimental import pallas as pl
from jax.experimental.pallas import tpu as pltpu


def _round_up(x, m):
    return ((x + m - 1) // m) * m


def _cdiv(a, b):
    return -(-a // b)


# ---------------------------------------------------------------------------
# Kernel
# ---------------------------------------------------------------------------
def _mlp_kernel(num_hidden, in_dim, compute_dtype, *refs):
    if num_hidden > 0:
        (x_ref, w1_ref, b1_ref, wh_ref, bh_ref, w2_ref, b2_ref,
         o_ref, xpad_ref) = refs
    else:
        x_ref, w1_ref, b1_ref, w2_ref, b2_ref, o_ref, xpad_ref = refs
        wh_ref = bh_ref = None

    # Cast f32 input tile to bf16 and zero-pad the contraction dim to K inside
    # VMEM (cheap VPU stores hidden under the MXU).  Zeroing the tail every
    # step keeps it correct under megacore grid sharding.
    tile_b, K = xpad_ref.shape
    if K > in_dim:
        xpad_ref[:, in_dim:] = jnp.zeros((tile_b, K - in_dim), compute_dtype)
    xpad_ref[:, :in_dim] = x_ref[...].astype(compute_dtype)

    # fc1: bf16 MXU matmul with f32 accumulation; bias + ReLU in f32 (VPU).
    h = jnp.dot(xpad_ref[...], w1_ref[...],
                preferred_element_type=jnp.float32)
    h = jnp.maximum(h + b1_ref[...], 0.0)

    # Hidden Linear + ReLU layers (static unroll; layer count is a trace-time
    # constant, so this stays a straight-line sequence of MXU pushes).
    for i in range(num_hidden):
        h = jnp.dot(h.astype(wh_ref.dtype), wh_ref[i],
                    preferred_element_type=jnp.float32)
        h = jnp.maximum(h + bh_ref[i], 0.0)

    # fc2 (no activation).  Output block is lane-dense (last dim = C = 128k).
    out = jnp.dot(h.astype(w2_ref.dtype), w2_ref[...],
                  preferred_element_type=jnp.float32)
    o_ref[...] = (out + b2_ref[...]).astype(o_ref.dtype)


# ---------------------------------------------------------------------------
# One-time parameter preparation (pad + bf16 cast; call once, reuse)
# ---------------------------------------------------------------------------
def prepare_params(params, compute_dtype=jnp.bfloat16):
    w1, b1, wh, bh, w2, b2 = params
    in_dim, hidden = w1.shape
    num_classes = w2.shape[1]
    num_hidden = wh.shape[0]

    K = _round_up(in_dim, 128)        # contraction dim of fc1 (128-granular)
    H = _round_up(hidden, 128)        # hidden width
    C = _round_up(num_classes, 128)   # lane-dense output width

    w1p = jnp.zeros((K, H), compute_dtype).at[:in_dim, :hidden].set(
        w1.astype(compute_dtype))
    b1p = jnp.zeros((1, H), jnp.float32).at[:, :hidden].set(b1)
    if num_hidden > 0:
        whp = jnp.zeros((num_hidden, H, H), compute_dtype
                        ).at[:, :hidden, :hidden].set(wh.astype(compute_dtype))
        bhp = jnp.zeros((num_hidden, 1, H), jnp.float32
                        ).at[:, :, :hidden].set(bh)
    else:
        whp, bhp = None, None
    w2p = jnp.zeros((H, C), compute_dtype).at[:hidden, :num_classes].set(
        w2.astype(compute_dtype))
    b2p = jnp.zeros((1, C), jnp.float32).at[:, :num_classes].set(b2)

    meta = dict(in_dim=in_dim, hidden=hidden, num_classes=num_classes,
                num_hidden=num_hidden, K=K, H=H, C=C)
    return (w1p, b1p, whp, bhp, w2p, b2p), meta


def _const_block_spec(shape, single_buffer):
    """BlockSpec for a weight/bias that is identical for every grid step."""
    idx = lambda i, _n=len(shape): (0,) * _n
    if single_buffer:
        # Fetched once -> single buffer halves resident-weight VMEM.
        return pl.BlockSpec(shape, idx, pipeline_mode=pl.Buffered(1))
    return pl.BlockSpec(shape, idx)


# ---------------------------------------------------------------------------
# Forward wrapper
# ---------------------------------------------------------------------------
def mlp_forward(x, prepped, meta, *, max_tile_b=1024):
    """x: (B, num_features, 50) or (B, num_features*50) float32."""
    w1p, b1p, whp, bhp, w2p, b2p = prepped
    K, H, C = meta["K"], meta["H"], meta["C"]
    in_dim = meta["in_dim"]
    num_hidden = meta["num_hidden"]
    num_classes = meta["num_classes"]
    compute_dtype = w1p.dtype

    B = x.shape[0]
    x2d = x.reshape(B, -1)
    if x2d.dtype != jnp.float32:
        x2d = x2d.astype(jnp.float32)

    # Tile selection: minimize batch-padding waste (pad < 16*n_steps rows),
    # 16-row granularity (bf16 sublane packing), and >= 2 grid steps for large
    # batches so "parallel" semantics can shard across v7x's two TensorCores.
    n_steps = max(1, _cdiv(B, max_tile_b))
    if n_steps == 1 and B > 256:
        n_steps = 2
    tile_b = _round_up(_cdiv(B, n_steps), 16)
    B_pad = tile_b * n_steps
    if B_pad != B:
        x2d = jnp.pad(x2d, ((0, B_pad - B), (0, 0)))

    weight_args = [w1p, b1p]
    if num_hidden > 0:
        weight_args += [whp, bhp]
    weight_args += [w2p, b2p]
    weight_bytes = sum(int(a.size) * a.dtype.itemsize for a in weight_args)

    # Generation-aware VMEM ceiling (v7x: 64 MiB/TC, v5e/v6e: 128 MiB).
    try:
        vmem_cap = int(getattr(pltpu.get_tpu_info(), "vmem_capacity_bytes",
                               64 << 20))
    except Exception:
        vmem_cap = 64 << 20
    vmem_ceiling = int(min(max(vmem_cap - (16 << 20), 16 << 20), 110 << 20))

    # Advisory cost estimate for XLA scheduling around the custom call.
    flops = 2 * B_pad * (K * H + num_hidden * H * H + H * C)
    bytes_accessed = (B_pad * in_dim * 4 + weight_bytes + B_pad * C * 4)
    cost = pl.CostEstimate(flops=int(flops), transcendentals=0,
                           bytes_accessed=int(bytes_accessed))

    kernel = functools.partial(_mlp_kernel, num_hidden, in_dim, compute_dtype)
    grid = (n_steps,)

    def run(single_buffer):
        in_specs = [pl.BlockSpec((tile_b, in_dim), lambda i: (i, 0))]
        args = [x2d]
        for arr in weight_args:
            in_specs.append(_const_block_spec(arr.shape, single_buffer))
            args.append(arr)
        out_specs = pl.BlockSpec((tile_b, C), lambda i: (i, 0))

        wbuf = 1 if single_buffer else 2
        vmem_est = (2 * tile_b * in_dim * 4     # double-buffered f32 x tiles
                    + 2 * tile_b * C * 4        # double-buffered f32 out tiles
                    + tile_b * K * 2            # bf16 padded-x scratch
                    + wbuf * weight_bytes       # resident weights / biases
                    + 4 * tile_b * H * 4)       # activation live ranges
        vmem_limit = int(min(max(vmem_est + (8 << 20), 16 << 20),
                             vmem_ceiling))

        out = pl.pallas_call(
            kernel,
            out_shape=jax.ShapeDtypeStruct((B_pad, C), jnp.float32),
            grid=grid,
            in_specs=in_specs,
            out_specs=out_specs,
            scratch_shapes=[pltpu.VMEM((tile_b, K), compute_dtype)],
            compiler_params=pltpu.CompilerParams(
                dimension_semantics=("parallel",),
                vmem_limit_bytes=vmem_limit),
            cost_estimate=cost,
        )(*args)
        return jax.block_until_ready(out)

    try:
        out = run(True)          # single-buffered resident weights
    except Exception:
        out = run(False)         # fallback: default double-buffered specs
    return out[:B, :num_classes]


# ---------------------------------------------------------------------------
# Init + references
# ---------------------------------------------------------------------------
def init_mlp_params(key, num_features, hidden_layer, layer_num, num_classes=3):
    """Deterministic init mimicking PyTorch Linear default U(-1/sqrt(fan_in), +).
    Weights stored already transposed to (in, out); biases as (1, out)."""
    in_dim = num_features * 50
    num_hidden = layer_num - 2
    keys = jax.random.split(key, 6)

    def uinit(k, shape, fan_in):
        bound = 1.0 / jnp.sqrt(jnp.float32(fan_in))
        return jax.random.uniform(k, shape, jnp.float32, -bound, bound)

    w1 = uinit(keys[0], (in_dim, hidden_layer), in_dim)
    b1 = uinit(keys[1], (1, hidden_layer), in_dim)
    wh = uinit(keys[2], (max(num_hidden, 1), hidden_layer, hidden_layer),
               hidden_layer)[:num_hidden]
    bh = uinit(keys[3], (max(num_hidden, 1), 1, hidden_layer),
               hidden_layer)[:num_hidden]
    w2 = uinit(keys[4], (hidden_layer, num_classes), hidden_layer)
    b2 = uinit(keys[5], (1, num_classes), hidden_layer)
    return (w1, b1, wh, bh, w2, b2)


def _ref_forward_f32(x, params):
    # Pure-JAX f32 reference (matches the PyTorch module semantics).
    w1, b1, wh, bh, w2, b2 = params
    h = x.reshape(x.shape[0], -1)
    h = jnp.maximum(h @ w1 + b1, 0.0)
    for i in range(wh.shape[0]):
        h = jnp.maximum(h @ wh[i] + bh[i], 0.0)
    return h @ w2 + b2


def _ref_forward_prepped(x, prepped, meta):
    # Pure-JAX reference using the same padded bf16 params as the kernel.
    w1p, b1p, whp, bhp, w2p, b2p = prepped
    B = x.shape[0]
    in_dim, K = meta["in_dim"], meta["K"]
    h = x.reshape(B, -1).astype(w1p.dtype)
    h = jnp.pad(h, ((0, 0), (0, K - in_dim)))
    h = jnp.maximum(
        jnp.dot(h, w1p, preferred_element_type=jnp.float32) + b1p, 0.0)
    for i in range(meta["num_hidden"]):
        h = jnp.maximum(
            jnp.dot(h.astype(whp.dtype), whp[i],
                    preferred_element_type=jnp.float32) + bhp[i], 0.0)
    out = jnp.dot(h.astype(w2p.dtype), w2p,
                  preferred_element_type=jnp.float32) + b2p
    return out[:, :meta["num_classes"]]


# ---------------------------------------------------------------------------
if __name__ == "__main__":
    num_features = 4
    hidden_layer = 32
    num_classes = 3
    batch = 2

    key = jax.random.PRNGKey(0)
    kx, kp = jax.random.split(key)
    x = jax.random.normal(kx, (batch, num_features, 50), jnp.float32)

    # layer_num=4 -> 2 hidden Linear+ReLU layers; layer_num=2 -> none
    # (exercises the zero-hidden-layer guard).
    for layer_num in (4, 2):
        params = init_mlp_params(kp, num_features, hidden_layer, layer_num,
                                 num_classes)
        prepped, meta = prepare_params(params)

        out = jax.block_until_ready(mlp_forward(x, prepped, meta))
        assert out.shape == (batch, num_classes)

        # NOTE: weights/activations run in bf16 on the MXU (f32 accumulation),
        # hence the looser tolerance vs the pure-f32 reference.
        ref_same_prec = _ref_forward_prepped(x, prepped, meta)
        ref_f32 = _ref_forward_f32(x, params)
        assert jnp.allclose(out, ref_same_prec, atol=5e-3, rtol=5e-3), (
            "kernel vs bf16 reference mismatch",
            float(jnp.max(jnp.abs(out - ref_same_prec))))
        assert jnp.allclose(out, ref_f32, atol=6e-2, rtol=6e-2), (
            "kernel vs f32 reference mismatch",
            float(jnp.max(jnp.abs(out - ref_f32))))

    print("KERNEL_OK")
</pallas_src>

<mosaic_0001>
module attributes {stable_mosaic.version = 11 : i64} {
  func.func @_mlp_kernel(%arg0: i32, %arg1: memref<16x200xf32, #tpu.memory_space<vmem>>, %arg2: memref<256x128xbf16, #tpu.memory_space<vmem>>, %arg3: memref<1x128xf32, #tpu.memory_space<vmem>>, %arg4: memref<2x128x128xbf16, #tpu.memory_space<vmem>>, %arg5: memref<2x1x128xf32, #tpu.memory_space<vmem>>, %arg6: memref<128x128xbf16, #tpu.memory_space<vmem>>, %arg7: memref<1x128xf32, #tpu.memory_space<vmem>>, %arg8: memref<16x128xf32, #tpu.memory_space<vmem>>, %arg9: memref<16x256xbf16, #tpu.memory_space<vmem>>) attributes {dimension_semantics = [#tpu.dimension_semantics<parallel>], iteration_bounds = array<i64: 1>, scalar_prefetch = 0 : i64, scratch_operands = 1 : i64, tpu.core_type = #tpu.core_type<tc>, window_params = [{transform_indices = @transform_0, window_bounds = array<i64: 16, 200>}, {pipeline_mode = #tpu.pipeline_mode<synchronous>, transform_indices = @transform_1, window_bounds = array<i64: 256, 128>}, {pipeline_mode = #tpu.pipeline_mode<synchronous>, transform_indices = @transform_2, window_bounds = array<i64: 1, 128>}, {pipeline_mode = #tpu.pipeline_mode<synchronous>, transform_indices = @transform_3, window_bounds = array<i64: 2, 128, 128>}, {pipeline_mode = #tpu.pipeline_mode<synchronous>, transform_indices = @transform_4, window_bounds = array<i64: 2, 1, 128>}, {pipeline_mode = #tpu.pipeline_mode<synchronous>, transform_indices = @transform_5, window_bounds = array<i64: 128, 128>}, {pipeline_mode = #tpu.pipeline_mode<synchronous>, transform_indices = @transform_6, window_bounds = array<i64: 1, 128>}, {transform_indices = @transform_7, window_bounds = array<i64: 16, 128>}]} {
    %cst = arith.constant 0.000000e+00 : bf16
    %0 = vector.broadcast %cst : bf16 to vector<16x56xbf16>
    %c0 = arith.constant 0 : index
    %c200 = arith.constant 200 : index
    %1 = vector.load %arg9[%c0, %c200] : memref<16x256xbf16, #tpu.memory_space<vmem>>, vector<16x56xbf16>
    tpu.vector_store %arg9[%c0, %c200], %0 {strides = array<i32>} : memref<16x256xbf16, #tpu.memory_space<vmem>>, vector<16x56xbf16>,
    %c0_0 = arith.constant 0 : index
    %c0_1 = arith.constant 0 : index
    %2 = vector.load %arg1[%c0_0, %c0_1] : memref<16x200xf32, #tpu.memory_space<vmem>>, vector<16x200xf32>
    %3 = arith.truncf %2 : vector<16x200xf32> to vector<16x200xbf16>
    %c0_2 = arith.constant 0 : index
    %c0_3 = arith.constant 0 : index
    %4 = vector.load %arg9[%c0_2, %c0_3] : memref<16x256xbf16, #tpu.memory_space<vmem>>, vector<16x200xbf16>
    tpu.vector_store %arg9[%c0_2, %c0_3], %3 {strides = array<i32>} : memref<16x256xbf16, #tpu.memory_space<vmem>>, vector<16x200xbf16>,
    %c0_4 = arith.constant 0 : index
    %c0_5 = arith.constant 0 : index
    %5 = vector.load %arg9[%c0_4, %c0_5] : memref<16x256xbf16, #tpu.memory_space<vmem>>, vector<16x256xbf16>
    %c0_6 = arith.constant 0 : index
    %c0_7 = arith.constant 0 : index
    %6 = vector.load %arg2[%c0_6, %c0_7] : memref<256x128xbf16, #tpu.memory_space<vmem>>, vector<256x128xbf16>
    %cst_8 = arith.constant dense<0.000000e+00> : vector<16x128xf32>
    %7 = tpu.matmul %5, %6, %cst_8 {dimension_numbers = #tpu.dot_dimension_numbers<[1], [0], [0], [1], [0, 0, 1, 1], [], []>} : vector<16x256xbf16>, vector<256x128xbf16>, vector<16x128xf32> -> vector<16x128xf32>
    %c0_9 = arith.constant 0 : index
    %c0_10 = arith.constant 0 : index
    %8 = vector.load %arg3[%c0_9, %c0_10] : memref<1x128xf32, #tpu.memory_space<vmem>>, vector<1x128xf32>
    %9 = vector.broadcast %8 : vector<1x128xf32> to vector<16x128xf32>
    %10 = arith.addf %7, %9 : vector<16x128xf32>
    %cst_11 = arith.constant 0.000000e+00 : f32
    %11 = vector.broadcast %cst_11 : f32 to vector<16x128xf32>
    %12 = arith.maximumf %10, %11 : vector<16x128xf32>
    %13 = arith.truncf %12 : vector<16x128xf32> to vector<16x128xbf16>
    %c0_12 = arith.constant 0 : index
    %c0_13 = arith.constant 0 : index
    %c0_14 = arith.constant 0 : index
    %14 = vector.load %arg4[%c0_12, %c0_13, %c0_14] : memref<2x128x128xbf16, #tpu.memory_space<vmem>>, vector<1x128x128xbf16>
    %15 = vector.shape_cast %14 : vector<1x128x128xbf16> to vector<128x128xbf16>
    %cst_15 = arith.constant dense<0.000000e+00> : vector<16x128xf32>
    %16 = tpu.matmul %13, %15, %cst_15 {dimension_numbers = #tpu.dot_dimension_numbers<[1], [0], [0], [1], [0, 0, 1, 1], [], []>} : vector<16x128xbf16>, vector<128x128xbf16>, vector<16x128xf32> -> vector<16x128xf32>
    %c0_16 = arith.constant 0 : index
    %c0_17 = arith.constant 0 : index
    %c0_18 = arith.constant 0 : index
    %17 = vector.load %arg5[%c0_16, %c0_17, %c0_18] : memref<2x1x128xf32, #tpu.memory_space<vmem>>, vector<1x1x128xf32>
    %18 = vector.shape_cast %17 : vector<1x1x128xf32> to vector<1x128xf32>
    %19 = vector.broadcast %18 : vector<1x128xf32> to vector<16x128xf32>
    %20 = arith.addf %16, %19 : vector<16x128xf32>
    %cst_19 = arith.constant 0.000000e+00 : f32
    %21 = vector.broadcast %cst_19 : f32 to vector<16x128xf32>
    %22 = arith.maximumf %20, %21 : vector<16x128xf32>
    %23 = arith.truncf %22 : vector<16x128xf32> to vector<16x128xbf16>
    %c1 = arith.constant 1 : index
    %c0_20 = arith.constant 0 : index
    %c0_21 = arith.constant 0 : index
    %24 = vector.load %arg4[%c1, %c0_20, %c0_21] : memref<2x128x128xbf16, #tpu.memory_space<vmem>>, vector<1x128x128xbf16>
    %25 = vector.shape_cast %24 : vector<1x128x128xbf16> to vector<128x128xbf16>
    %cst_22 = arith.constant dense<0.000000e+00> : vector<16x128xf32>
    %26 = tpu.matmul %23, %25, %cst_22 {dimension_numbers = #tpu.dot_dimension_numbers<[1], [0], [0], [1], [0, 0, 1, 1], [], []>} : vector<16x128xbf16>, vector<128x128xbf16>, vector<16x128xf32> -> vector<16x128xf32>
    %c1_23 = arith.constant 1 : index
    %c0_24 = arith.constant 0 : index
    %c0_25 = arith.constant 0 : index
    %27 = vector.load %arg5[%c1_23, %c0_24, %c0_25] : memref<2x1x128xf32, #tpu.memory_space<vmem>>, vector<1x1x128xf32>
    %28 = vector.shape_cast %27 : vector<1x1x128xf32> to vector<1x128xf32>
    %29 = vector.broadcast %28 : vector<1x128xf32> to vector<16x128xf32>
    %30 = arith.addf %26, %29 : vector<16x128xf32>
    %cst_26 = arith.constant 0.000000e+00 : f32
    %31 = vector.broadcast %cst_26 : f32 to vector<16x128xf32>
    %32 = arith.maximumf %30, %31 : vector<16x128xf32>
    %33 = arith.truncf %32 : vector<16x128xf32> to vector<16x128xbf16>
    %c0_27 = arith.constant 0 : index
    %c0_28 = arith.constant 0 : index
    %34 = vector.load %arg6[%c0_27, %c0_28] : memref<128x128xbf16, #tpu.memory_space<vmem>>, vector<128x128xbf16>
    %cst_29 = arith.constant dense<0.000000e+00> : vector<16x128xf32>
    %35 = tpu.matmul %33, %34, %cst_29 {dimension_numbers = #tpu.dot_dimension_numbers<[1], [0], [0], [1], [0, 0, 1, 1], [], []>} : vector<16x128xbf16>, vector<128x128xbf16>, vector<16x128xf32> -> vector<16x128xf32>
    %c0_30 = arith.constant 0 : index
    %c0_31 = arith.constant 0 : index
    %36 = vector.load %arg7[%c0_30, %c0_31] : memref<1x128xf32, #tpu.memory_space<vmem>>, vector<1x128xf32>
    %37 = vector.broadcast %36 : vector<1x128xf32> to vector<16x128xf32>
    %38 = arith.addf %35, %37 : vector<16x128xf32>
    %c0_32 = arith.constant 0 : index
    %c0_33 = arith.constant 0 : index
    %39 = vector.load %arg8[%c0_32, %c0_33] : memref<16x128xf32, #tpu.memory_space<vmem>>, vector<16x128xf32>
    tpu.vector_store %arg8[%c0_32, %c0_33], %38 {strides = array<i32>} : memref<16x128xf32, #tpu.memory_space<vmem>>, vector<16x128xf32>,
    return
  }
  func.func @transform_0(%arg0: i32) -> (i32, i32) {
    %c0_i32 = arith.constant 0 : i32
    %c0_i32_0 = arith.constant 0 : i32
    return %arg0, %c0_i32 : i32, i32
  }
  func.func @transform_1(%arg0: i32) -> (i32, i32) {
    %c0_i32 = arith.constant 0 : i32
    %c0_i32_0 = arith.constant 0 : i32
    %c0_i32_1 = arith.constant 0 : i32
    return %c0_i32, %c0_i32_0 : i32, i32
  }
  func.func @transform_2(%arg0: i32) -> (i32, i32) {
    %c0_i32 = arith.constant 0 : i32
    %c0_i32_0 = arith.constant 0 : i32
    %c0_i32_1 = arith.constant 0 : i32
    return %c0_i32, %c0_i32_0 : i32, i32
  }
  func.func @transform_3(%arg0: i32) -> (i32, i32, i32) {
    %c0_i32 = arith.constant 0 : i32
    %c0_i32_0 = arith.constant 0 : i32
    %c0_i32_1 = arith.constant 0 : i32
    %c0_i32_2 = arith.constant 0 : i32
    return %c0_i32, %c0_i32_0, %c0_i32_1 : i32, i32, i32
  }
  func.func @transform_4(%arg0: i32) -> (i32, i32, i32) {
    %c0_i32 = arith.constant 0 : i32
    %c0_i32_0 = arith.constant 0 : i32
    %c0_i32_1 = arith.constant 0 : i32
    %c0_i32_2 = arith.constant 0 : i32
    return %c0_i32, %c0_i32_0, %c0_i32_1 : i32, i32, i32
  }
  func.func @transform_5(%arg0: i32) -> (i32, i32) {
    %c0_i32 = arith.constant 0 : i32
    %c0_i32_0 = arith.constant 0 : i32
    %c0_i32_1 = arith.constant 0 : i32
    return %c0_i32, %c0_i32_0 : i32, i32
  }
  func.func @transform_6(%arg0: i32) -> (i32, i32) {
    %c0_i32 = arith.constant 0 : i32
    %c0_i32_0 = arith.constant 0 : i32
    %c0_i32_1 = arith.constant 0 : i32
    return %c0_i32, %c0_i32_0 : i32, i32
  }
  func.func @transform_7(%arg0: i32) -> (i32, i32) {
    %c0_i32 = arith.constant 0 : i32
    %c0_i32_0 = arith.constant 0 : i32
    return %arg0, %c0_i32 : i32, i32
  }
}

module attributes {stable_mosaic.version = 11 : i64} {
  func.func @_mlp_kernel(%arg0: i32, %arg1: memref<16x200xf32, #tpu.memory_space<vmem>>, %arg2: memref<256x128xbf16, #tpu.memory_space<vmem>>, %arg3: memref<1x128xf32, #tpu.memory_space<vmem>>, %arg4: memref<2x128x128xbf16, #tpu.memory_space<vmem>>, %arg5: memref<2x1x128xf32, #tpu.memory_space<vmem>>, %arg6: memref<128x128xbf16, #tpu.memory_space<vmem>>, %arg7: memref<1x128xf32, #tpu.memory_space<vmem>>, %arg8: memref<16x128xf32, #tpu.memory_space<vmem>>, %arg9: memref<16x256xbf16, #tpu.memory_space<vmem>>) attributes {dimension_semantics = [#tpu.dimension_semantics<parallel>], iteration_bounds = array<i64: 1>, scalar_prefetch = 0 : i64, scratch_operands = 1 : i64, tpu.core_type = #tpu.core_type<tc>, window_params = [{transform_indices = @transform_0, window_bounds = array<i64: 16, 200>}, {pipeline_mode = #tpu.pipeline_mode<synchronous>, transform_indices = @transform_1, window_bounds = array<i64: 256, 128>}, {pipeline_mode = #tpu.pipeline_mode<synchronous>, transform_indices = @transform_2, window_bounds = array<i64: 1, 128>}, {pipeline_mode = #tpu.pipeline_mode<synchronous>, transform_indices = @transform_3, window_bounds = array<i64: 2, 128, 128>}, {pipeline_mode = #tpu.pipeline_mode<synchronous>, transform_indices = @transform_4, window_bounds = array<i64: 2, 1, 128>}, {pipeline_mode = #tpu.pipeline_mode<synchronous>, transform_indices = @transform_5, window_bounds = array<i64: 128, 128>}, {pipeline_mode = #tpu.pipeline_mode<synchronous>, transform_indices = @transform_6, window_bounds = array<i64: 1, 128>}, {transform_indices = @transform_7, window_bounds = array<i64: 16, 128>}]} {
    %cst = arith.constant 0.000000e+00 : bf16
    %0 = vector.broadcast %cst : bf16 to vector<16x56xbf16>
    %c0 = arith.constant 0 : index
    %c200 = arith.constant 200 : index
    %1 = vector.load %arg9[%c0, %c200] : memref<16x256xbf16, #tpu.memory_space<vmem>>, vector<16x56xbf16>
    tpu.vector_store %arg9[%c0, %c200], %0 {strides = array<i32>} : memref<16x256xbf16, #tpu.memory_space<vmem>>, vector<16x56xbf16>,
    %c0_0 = arith.constant 0 : index
    %c0_1 = arith.constant 0 : index
    %2 = vector.load %arg1[%c0_0, %c0_1] : memref<16x200xf32, #tpu.memory_space<vmem>>, vector<16x200xf32>
    %3 = arith.truncf %2 : vector<16x200xf32> to vector<16x200xbf16>
    %c0_2 = arith.constant 0 : index
    %c0_3 = arith.constant 0 : index
    %4 = vector.load %arg9[%c0_2, %c0_3] : memref<16x256xbf16, #tpu.memory_space<vmem>>, vector<16x200xbf16>
    tpu.vector_store %arg9[%c0_2, %c0_3], %3 {strides = array<i32>} : memref<16x256xbf16, #tpu.memory_space<vmem>>, vector<16x200xbf16>,
    %c0_4 = arith.constant 0 : index
    %c0_5 = arith.constant 0 : index
    %5 = vector.load %arg9[%c0_4, %c0_5] : memref<16x256xbf16, #tpu.memory_space<vmem>>, vector<16x256xbf16>
    %c0_6 = arith.constant 0 : index
    %c0_7 = arith.constant 0 : index
    %6 = vector.load %arg2[%c0_6, %c0_7] : memref<256x128xbf16, #tpu.memory_space<vmem>>, vector<256x128xbf16>
    %cst_8 = arith.constant dense<0.000000e+00> : vector<16x128xf32>
    %7 = tpu.matmul %5, %6, %cst_8 {dimension_numbers = #tpu.dot_dimension_numbers<[1], [0], [0], [1], [0, 0, 1, 1], [], []>} : vector<16x256xbf16>, vector<256x128xbf16>, vector<16x128xf32> -> vector<16x128xf32>
    %c0_9 = arith.constant 0 : index
    %c0_10 = arith.constant 0 : index
    %8 = vector.load %arg3[%c0_9, %c0_10] : memref<1x128xf32, #tpu.memory_space<vmem>>, vector<1x128xf32>
    %9 = vector.broadcast %8 : vector<1x128xf32> to vector<16x128xf32>
    %10 = arith.addf %7, %9 : vector<16x128xf32>
    %cst_11 = arith.constant 0.000000e+00 : f32
    %11 = vector.broadcast %cst_11 : f32 to vector<16x128xf32>
    %12 = arith.maximumf %10, %11 : vector<16x128xf32>
    %13 = arith.truncf %12 : vector<16x128xf32> to vector<16x128xbf16>
    %c0_12 = arith.constant 0 : index
    %c0_13 = arith.constant 0 : index
    %c0_14 = arith.constant 0 : index
    %14 = vector.load %arg4[%c0_12, %c0_13, %c0_14] : memref<2x128x128xbf16, #tpu.memory_space<vmem>>, vector<1x128x128xbf16>
    %15 = vector.shape_cast %14 : vector<1x128x128xbf16> to vector<128x128xbf16>
    %cst_15 = arith.constant dense<0.000000e+00> : vector<16x128xf32>
    %16 = tpu.matmul %13, %15, %cst_15 {dimension_numbers = #tpu.dot_dimension_numbers<[1], [0], [0], [1], [0, 0, 1, 1], [], []>} : vector<16x128xbf16>, vector<128x128xbf16>, vector<16x128xf32> -> vector<16x128xf32>
    %c0_16 = arith.constant 0 : index
    %c0_17 = arith.constant 0 : index
    %c0_18 = arith.constant 0 : index
    %17 = vector.load %arg5[%c0_16, %c0_17, %c0_18] : memref<2x1x128xf32, #tpu.memory_space<vmem>>, vector<1x1x128xf32>
    %18 = vector.shape_cast %17 : vector<1x1x128xf32> to vector<1x128xf32>
    %19 = vector.broadcast %18 : vector<1x128xf32> to vector<16x128xf32>
    %20 = arith.addf %16, %19 : vector<16x128xf32>
    %cst_19 = arith.constant 0.000000e+00 : f32
    %21 = vector.broadcast %cst_19 : f32 to vector<16x128xf32>
    %22 = arith.maximumf %20, %21 : vector<16x128xf32>
    %23 = arith.truncf %22 : vector<16x128xf32> to vector<16x128xbf16>
    %c1 = arith.constant 1 : index
    %c0_20 = arith.constant 0 : index
    %c0_21 = arith.constant 0 : index
    %24 = vector.load %arg4[%c1, %c0_20, %c0_21] : memref<2x128x128xbf16, #tpu.memory_space<vmem>>, vector<1x128x128xbf16>
    %25 = vector.shape_cast %24 : vector<1x128x128xbf16> to vector<128x128xbf16>
    %cst_22 = arith.constant dense<0.000000e+00> : vector<16x128xf32>
    %26 = tpu.matmul %23, %25, %cst_22 {dimension_numbers = #tpu.dot_dimension_numbers<[1], [0], [0], [1], [0, 0, 1, 1], [], []>} : vector<16x128xbf16>, vector<128x128xbf16>, vector<16x128xf32> -> vector<16x128xf32>
    %c1_23 = arith.constant 1 : index
    %c0_24 = arith.constant 0 : index
    %c0_25 = arith.constant 0 : index
    %27 = vector.load %arg5[%c1_23, %c0_24, %c0_25] : memref<2x1x128xf32, #tpu.memory_space<vmem>>, vector<1x1x128xf32>
    %28 = vector.shape_cast %27 : vector<1x1x128xf32> to vector<1x128xf32>
    %29 = vector.broadcast %28 : vector<1x128xf32> to vector<16x128xf32>
    %30 = arith.addf %26, %29 : vector<16x128xf32>
    %cst_26 = arith.constant 0.000000e+00 : f32
    %31 = vector.broadcast %cst_26 : f32 to vector<16x128xf32>
    %32 = arith.maximumf %30, %31 : vector<16x128xf32>
    %33 = arith.truncf %32 : vector<16x128xf32> to vector<16x128xbf16>
    %c0_27 = arith.constant 0 : index
    %c0_28 = arith.constant 0 : index
    %34 = vector.load %arg6[%c0_27, %c0_28] : memref<128x128xbf16, #tpu.memory_space<vmem>>, vector<128x128xbf16>
    %cst_29 = arith.constant dense<0.000000e+00> : vector<16x128xf32>
    %35 = tpu.matmul %33, %34, %cst_29 {dimension_numbers = #tpu.dot_dimension_numbers<[1], [0], [0], [1], [0, 0, 1, 1], [], []>} : vector<16x128xbf16>, vector<128x128xbf16>, vector<16x128xf32> -> vector<16x128xf32>
    %c0_30 = arith.constant 0 : index
    %c0_31 = arith.constant 0 : index
    %36 = vector.load %arg7[%c0_30, %c0_31] : memref<1x128xf32, #tpu.memory_space<vmem>>, vector<1x128xf32>
    %37 = vector.broadcast %36 : vector<1x128xf32> to vector<16x128xf32>
    %38 = arith.addf %35, %37 : vector<16x128xf32>
    %c0_32 = arith.constant 0 : index
    %c0_33 = arith.constant 0 : index
    %39 = vector.load %arg8[%c0_32, %c0_33] : memref<16x128xf32, #tpu.memory_space<vmem>>, vector<16x128xf32>
    tpu.vector_store %arg8[%c0_32, %c0_33], %38 {strides = array<i32>} : memref<16x128xf32, #tpu.memory_space<vmem>>, vector<16x128xf32>,
    return
  }
  func.func @transform_0(%arg0: i32) -> (i32, i32) {
    %c0_i32 = arith.constant 0 : i32
    %c0_i32_0 = arith.constant 0 : i32
    return %arg0, %c0_i32 : i32, i32
  }
  func.func @transform_1(%arg0: i32) -> (i32, i32) {
    %c0_i32 = arith.constant 0 : i32
    %c0_i32_0 = arith.constant 0 : i32
    %c0_i32_1 = arith.constant 0 : i32
    return %c0_i32, %c0_i32_0 : i32, i32
  }
  func.func @transform_2(%arg0: i32) -> (i32, i32) {
    %c0_i32 = arith.constant 0 : i32
    %c0_i32_0 = arith.constant 0 : i32
    %c0_i32_1 = arith.constant 0 : i32
    return %c0_i32, %c0_i32_0 : i32, i32
  }
  func.func @transform_3(%arg0: i32) -> (i32, i32, i32) {
    %c0_i32 = arith.constant 0 : i32
    %c0_i32_0 = arith.constant 0 : i32
    %c0_i32_1 = arith.constant 0 : i32
    %c0_i32_2 = arith.constant 0 : i32
    return %c0_i32, %c0_i32_0, %c0_i32_1 : i32, i32, i32
  }
  func.func @transform_4(%arg0: i32) -> (i32, i32, i32) {
    %c0_i32 = arith.constant 0 : i32
    %c0_i32_0 = arith.constant 0 : i32
    %c0_i32_1 = arith.constant 0 : i32
    %c0_i32_2 = arith.constant 0 : i32
    return %c0_i32, %c0_i32_0, %c0_i32_1 : i32, i32, i32
  }
  func.func @transform_5(%arg0: i32) -> (i32, i32) {
    %c0_i32 = arith.constant 0 : i32
    %c0_i32_0 = arith.constant 0 : i32
    %c0_i32_1 = arith.constant 0 : i32
    return %c0_i32, %c0_i32_0 : i32, i32
  }
  func.func @transform_6(%arg0: i32) -> (i32, i32) {
    %c0_i32 = arith.constant 0 : i32
    %c0_i32_0 = arith.constant 0 : i32
    %c0_i32_1 = arith.constant 0 : i32
    return %c0_i32, %c0_i32_0 : i32, i32
  }
  func.func @transform_7(%arg0: i32) -> (i32, i32) {
    %c0_i32 = arith.constant 0 : i32
    %c0_i32_0 = arith.constant 0 : i32
    return %arg0, %c0_i32 : i32, i32
  }
}

</mosaic_0001>

<bundles_post_ra>
// kernel: tpu_custom_call.1
= control target key start
LH: loop header
LB: loop body
LE: loop exit
PB: predicated region body
PF: predicated region fallthrough
CT: control target
= control target key end

     0   :  { %12 = vsyncpa [#allocation4], 0  ;;  %s1138_s0 = inlined_call_operand.hbm [shape: f32[16,200], index: 0, kind: input, shape index: {}]   ;;  %s1139_s1 = inlined_call_operand.hbm [shape: bf16[256,128], index: 1, kind: input, shape index: {}]   ;;  %s1140_s2 = inlined_call_operand.vmem [shape: f32[1,128], index: 2, kind: input, shape index: {}]   ;;  %s1141_s3 = inlined_call_operand.hbm [shape: bf16[2,128,128], index: 3, kind: input, shape index: {}]   ;;  %s1142_s4 = inlined_call_operand.vmem [shape: f32[2,1,128], index: 4, kind: input, shape index: {}]   ;;  %s1143_s5 = inlined_call_operand.hbm [shape: bf16[128,128], index: 5, kind: input, shape index: {}]   ;;  %s1144_s6 = inlined_call_operand.vmem [shape: f32[1,128], index: 6, kind: input, shape index: {}]   ;;  %s1145_s7 = inlined_call_operand.hbm [shape: f32[16,128], index: 7, kind: output, shape index: {}]  }
   0x1   :  { %13 = vsyncpa [#allocation7], 0 }
   0x2   :  { %14 = vsyncpa [#allocation10], 0 }
   0x3   :  { %15 = vsyncpa [#allocation5], 0  ;;  %s966_s24 = smov [#allocation6]   ;;  %s848_s28 = scalar_lea.hbm %s1139_s1, 2048 }
   0x4   :  { %s33_s25 = sshll.u32 %s966_s24, 4  ;;  %p849_p0 = scmp.ne.s32.totalorder %s1139_s1, %s848_s28  ;;  %s34_s25 = int_to_ptr.vmem [resolvable:$true] %s33_s25 }
   0x5   :  { %p852_p1 = scmp.lt.u32.totalorder %s848_s28, %s1139_s1 }
   0x7   :  { %p854_p2 = pnand %p852_p1, %p849_p0 }
   0x9   :  { %857 = shalt.err (!%p854_p2)
}
   0xa   :  { %s858_s10 = scalar_lea.vmem %s34_s25, 2048  ;;  %p863_p4 = scmp.lt.s32.totalorder %s34_s25, %s34_s25 }
   0xb   :  { %p859_p3 = scmp.ne.s32.totalorder %s34_s25, %s858_s10  ;;  %p864_p5 = scmp.lt.s32.totalorder %s858_s10, %s858_s10 }
   0xd   :  { %p865_p6 = por %p864_p5, %p863_p4 }
   0xf   :  { %p866_p7 = pnand %p865_p6, %p859_p3 }
  0x11   :  { %869 = shalt.err (!%p866_p7)
}
  0x12   :  { %s967_s11 = smov 64   ;;  %s968_s12 = smov 4  }
  0x13   :  { %39 = dma.hbm_to_vmem [thread:$0]  %s1139_s1, 2048, %s34_s25, [#allocation7], %s967_s11, %s967_s11, %s968_s12  }
  0x14   :  { %s969_s15 = smov [#allocation3]   ;;  %s870_s19 = scalar_lea.hbm %s1138_s0, 512 }
  0x15   :  { %s21_s16 = sshll.u32 %s969_s15, 4  ;;  %p871_p8 = scmp.ne.s32.totalorder %s1138_s0, %s870_s19  ;;  %s22_s16 = int_to_ptr.vmem [resolvable:$true] %s21_s16 }
  0x16   :  { %p874_p9 = scmp.lt.u32.totalorder %s870_s19, %s1138_s0 }
  0x18   :  { %p876_p10 = pnand %p874_p9, %p871_p8 }
  0x1a   :  { %879 = shalt.err (!%p876_p10)
}
  0x1b   :  { %s880_s24 = scalar_lea.vmem %s22_s16, 512  ;;  %p885_p12 = scmp.lt.s32.totalorder %s22_s16, %s22_s16 }
  0x1c   :  { %p881_p11 = scmp.ne.s32.totalorder %s22_s16, %s880_s24  ;;  %p886_p13 = scmp.lt.s32.totalorder %s880_s24, %s880_s24 }
  0x1e   :  { %p887_p0 = por %p886_p13, %p885_p12 }
  0x20   :  { %p888_p1 = pnand %p887_p0, %p881_p11 }
  0x22   :  { %891 = shalt.err (!%p888_p1)
}
  0x23   :  { %s970_s1 = smov 256   ;;  %s971_s25 = smov 16  }
  0x24   :  { %27 = dma.hbm_to_vmem [thread:$0]  %s1138_s0, 512, %s22_s16, [#allocation4], %s970_s1, %s970_s1, %s971_s25  }
  0x25   :  { %s972_s28 = smov [#allocation8]   ;;  %s973_s30 = smov [#allocation9]  }
  0x26   :  { %s47_s29 = sshll.u32 %s972_s28, 4  ;;  %s61_s8 = sshll.u32 %s973_s30, 4  ;;  %s48_s29 = int_to_ptr.vmem [resolvable:$true] %s47_s29  ;;  %s1047_s8 = int_to_ptr.vmem [resolvable:$true] %s61_s8 }
  0x27   :  { %s892_s13 = scalar_lea.hbm %s1141_s3, 2048 }
  0x28   :  { %p893_p2 = scmp.ne.s32.totalorder %s1141_s3, %s892_s13  ;;  %p896_p3 = scmp.lt.u32.totalorder %s892_s13, %s1141_s3 }
  0x2a   :  { %p898_p4 = pnand %p896_p3, %p893_p2 }
  0x2c   :  { %901 = shalt.err (!%p898_p4)
}
  0x2d   :  { %s902_s0 = scalar_lea.vmem %s48_s29, 2048  ;;  %p907_p6 = scmp.lt.s32.totalorder %s48_s29, %s48_s29 }
  0x2e   :  { %p903_p5 = scmp.ne.s32.totalorder %s48_s29, %s902_s0  ;;  %p908_p7 = scmp.lt.s32.totalorder %s902_s0, %s902_s0 }
  0x30   :  { %p909_p8 = por %p908_p7, %p907_p6 }
  0x32   :  { %p910_p9 = pnand %p909_p8, %p903_p5 }
  0x34   :  { %913 = shalt.err (!%p910_p9)
}
  0x35   :  { %53 = dma.hbm_to_vmem [thread:$0]  %s1141_s3, 2048, %s48_s29, [#allocation7], %s967_s11, %s967_s11, %s968_s12  }
  0x36   :  { %s914_s22 = scalar_lea.hbm %s1143_s5, 1024 }
  0x37   :  { %p915_p10 = scmp.ne.s32.totalorder %s1143_s5, %s914_s22  ;;  %p918_p11 = scmp.lt.u32.totalorder %s914_s22, %s1143_s5 }
  0x39   :  { %p920_p12 = pnand %p918_p11, %p915_p10 }
  0x3b   :  { %923 = shalt.err (!%p920_p12)
}
  0x3c   :  { %s924_s26 = scalar_lea.vmem %s1047_s8, 1024  ;;  %p929_p0 = scmp.lt.s32.totalorder %s1047_s8, %s1047_s8 }
  0x3d   :  { %p925_p13 = scmp.ne.s32.totalorder %s1047_s8, %s924_s26  ;;  %p930_p1 = scmp.lt.s32.totalorder %s924_s26, %s924_s26 }
  0x3f   :  { %p931_p2 = por %p930_p1, %p929_p0 }
  0x41   :  { %p932_p3 = pnand %p931_p2, %p925_p13 }
  0x43   :  { %935 = shalt.err (!%p932_p3)
}
  0x44   :  { %67 = dma.hbm_to_vmem [thread:$0]  %s1143_s5, 1024, %s1047_s8, [#allocation10], %s967_s11, %s967_s11, %s968_s12  }
  0x45   :  { %958 = dma.done.wait [#allocation4], 512  }
  0x46   :  { %959 = vsyncadd [#allocation4], 4294966784 }
  0x47   :  { %960 = dma.done.wait [#allocation7], 4096  }
  0x48   :  { %961 = vsyncadd [#allocation7], 4294963200 }
  0x49   :  { %962 = dma.done.wait [#allocation10], 1024  }
  0x4a   :  { %963 = vsyncadd [#allocation10], 4294966272  ;;  %vm83_vm0 = vcmask 1048128   ;;  %v974_v0 = vmov 0   ;;  %v975_v1 = vmov 0.0   ;;  %v808_v2 = vld [vmem:[#allocation6 + $0x40] sm:$0xff]  }
  0x4b   :  { %84 = vst.msk [vmem:[#allocation2 + $0x8] sm:$0xff] %vm83_vm0, %v974_v0  ;;  %734 = vmatprep.subr.bf16.mxu1 %v975_v1  ;;  %v809_v3 = vld [vmem:[#allocation6] sm:$0xff]   ;;  %685 = vmatprep.subr.bf16.mxu0 %v808_v2  ;;  %v810_v4 = vld [vmem:[#allocation6 + $0x48] sm:$0xff]   ;;  %v812_v6 = vld [vmem:[#allocation6 + $0x50] sm:$0xff]   ;;  %vm92_vm1 = vcmask 588800   ;;  %vm976_vm2 = vmmov 0  }
  0x4c   :  { %686 = vmatpush3.bf16.msra.mxu0 %v809_v3  ;;  %v811_v5 = vld [vmem:[#allocation6 + $0x8] sm:$0xff]   ;;  %v813_v7 = vld [vmem:[#allocation6 + $0x10] sm:$0xff]   ;;  %v814_v8 = vld [vmem:[#allocation6 + $0x58] sm:$0xff]   ;;  %750 = vmatprep.mubr.msk.bf16.mxu1 %vm976_vm2, %v975_v1  ;;  %s977_s9 = smov [#allocation11]  }
  0x4d   :  { %687 = vmatprep.subr.bf16.mxu0 %v810_v4  ;;  %v815_v9 = vld [vmem:[#allocation6 + $0x18] sm:$0xff]   ;;  %v816_v10 = vld [vmem:[#allocation6 + $0x60] sm:$0xff]   ;;  %v818_v12 = vld [vmem:[#allocation6 + $0x68] sm:$0xff]   ;;  %s626_s10 = sshll.u32 %s977_s9, 4  ;;  %s627_s10 = int_to_ptr.vmem [resolvable:$true] %s626_s10 }
  0x4e   :  { %v817_v11 = vld [vmem:[#allocation6 + $0x20] sm:$0xff]   ;;  %v86_v13 = vld [vmem:[#allocation3 + $0x8] sm:$0xff]  ;;  %v88_v14 = vld [vmem:[#allocation3 + $0x18] sm:$0xff]  ;;  %p941_p5 = scmp.lt.s32.totalorder %s627_s10, %s627_s10 }
  0x4f   :  { %v85_v15 = vld [vmem:[#allocation3] sm:$0xff]  ;;  %v819_v16 = vld [vmem:[#allocation6 + $0x28] sm:$0xff]   ;;  %v90_v17 = vpack.c.bf16 %v88_v14, %v86_v13  ;;  %v87_v18 = vld [vmem:[#allocation3 + $0x10] sm:$0xff] }
  0x50   :  { %688 = vmatpush3.bf16.msra.mxu0 %v811_v5  ;;  %v89_v19 = vpack.c.bf16 %v87_v18, %v85_v15  ;;  %v824_v20 = vld [vmem:[#allocation8] sm:$0xff]   ;;  %v820_v21 = vld [vmem:[#allocation6 + $0x70] sm:$0xff]   ;;  %v825_v22 = vld [vmem:[#allocation8 + $0x8] sm:$0xff]  }
  0x51   :  { %689 = vmatprep.subr.bf16.mxu0 %v812_v6  ;;  %93 = vst.msk [vmem:[#allocation2 + $0x8] sm:$0xff] %vm92_vm1, %v90_v17  ;;  %735 = vmatpush3.bf16.msra.mxu1 %v824_v20  ;;  %v821_v23 = vld [vmem:[#allocation6 + $0x30] sm:$0xff]   ;;  %v822_v24 = vld [vmem:[#allocation6 + $0x78] sm:$0xff]   ;;  %v828_v29 = vld [vmem:[#allocation8 + $0x20] sm:$0xff]  }
  0x52   :  { %736 = vmatprep.subr.bf16.mxu1 %v975_v1  ;;  %v826_v25 = vld [vmem:[#allocation8 + $0x10] sm:$0xff]   ;;  %v823_v26 = vld [vmem:[#allocation6 + $0x38] sm:$0xff]   ;;  %v829_v30 = vld [vmem:[#allocation8 + $0x28] sm:$0xff]  }
  0x53   :  { %v827_v28 = vld [vmem:[#allocation8 + $0x18] sm:$0xff]   ;;  %v830_v31 = vld [vmem:[#allocation8 + $0x30] sm:$0xff]   ;;  %v832_v33 = vld [vmem:[#allocation8 + $0x40] sm:$0xff]  }
  0x54   :  { %690 = vmatpush3.bf16.msra.mxu0 %v813_v7  ;;  %v831_v32 = vld [vmem:[#allocation8 + $0x38] sm:$0xff]   ;;  %v833_v34 = vld [vmem:[#allocation8 + $0x48] sm:$0xff]   ;;  %v834_v35 = vld [vmem:[#allocation8 + $0x50] sm:$0xff]  }
  0x55   :  { %691 = vmatprep.subr.bf16.mxu0 %v814_v8  ;;  %737 = vmatpush3.bf16.msra.mxu1 %v825_v22  ;;  %v835_v36 = vld [vmem:[#allocation8 + $0x58] sm:$0xff]   ;;  %v836_v37 = vld [vmem:[#allocation8 + $0x60] sm:$0xff]   ;;  %v837_v38 = vld [vmem:[#allocation8 + $0x68] sm:$0xff]  }
  0x56   :  { %738 = vmatprep.subr.bf16.mxu1 %v975_v1  ;;  %v640_v40 = vld [vmem:[%s1140_s2] ss:$0 sm:$0xff]  ;;  %v839_v52 = vld [vmem:[#allocation8 + $0x78] sm:$0xff]   ;;  %v840_v53 = vld [vmem:[#allocation9] sm:$0xff]  }
  0x57   :  { %v838_v51 = vld [vmem:[#allocation8 + $0x70] sm:$0xff]   ;;  %v841_v54 = vld [vmem:[#allocation9 + $0x8] sm:$0xff]   ;;  %v843_v56 = vld [vmem:[#allocation9 + $0x18] sm:$0xff]  }
  0x58   :  { %692 = vmatpush3.bf16.msra.mxu0 %v815_v9  ;;  %v95_v27 = vld [vmem:[#allocation2 + $0x8] sm:$0xff]  ;;  %v842_v55 = vld [vmem:[#allocation9 + $0x10] sm:$0xff]   ;;  %v844_v57 = vld [vmem:[#allocation9 + $0x20] sm:$0xff]  }
  0x59   :  { %693 = vmatprep.subr.bf16.mxu0 %v816_v10  ;;  %263 = vmatprep.mubr.bf16.mxu0 %v95_v27  ;;  %v845_v58 = vld [vmem:[#allocation9 + $0x28] sm:$0xff]   ;;  %v657_v59 = vld [vmem:[%s1142_s4] ss:$0 sm:$0xff]  ;;  %v847_v7 = vld [vmem:[#allocation9 + $0x38] sm:$0xff]  }
  0x5a   :  { %739 = vmatpush3.bf16.msra.mxu1 %v826_v25  ;;  %v846_v6 = vld [vmem:[#allocation9 + $0x30] sm:$0xff]  }
  0x5b   :  { %740 = vmatprep.subr.bf16.mxu1 %v975_v1  ;;  %v667_v8 = vld [vmem:[%s1142_s4 + $0x1] ss:$0 sm:$0xff]  ;;  %s936_s4 = scalar_lea.vmem %s627_s10, 256 }
  0x5c   :  { %694 = vmatpush3.bf16.msra.mxu0 %v817_v11  ;;  %p937_p4 = scmp.ne.s32.totalorder %s627_s10, %s936_s4  ;;  %p942_p6 = scmp.lt.s32.totalorder %s936_s4, %s936_s4 }
  0x5d   :  { %695 = vmatprep.subr.bf16.mxu0 %v818_v12 }
  0x5e   :  { %741 = vmatpush3.bf16.msra.mxu1 %v827_v28  ;;  %p943_p7 = por %p942_p6, %p941_p5 }
  0x5f   :  { %742 = vmatprep.subr.bf16.mxu1 %v975_v1 }
  0x60   :  { %696 = vmatpush3.bf16.msra.mxu0 %v819_v16  ;;  %p944_p8 = pnand %p943_p7, %p937_p4 }
  0x61   :  { %697 = vmatprep.subr.bf16.mxu0 %v820_v21 }
  0x62   :  { %743 = vmatpush3.bf16.msra.mxu1 %v828_v29 }
  0x63   :  { %744 = vmatprep.subr.bf16.mxu1 %v975_v1 }
  0x64   :  { %698 = vmatpush3.bf16.msra.mxu0 %v821_v23 }
  0x65   :  { %699 = vmatprep.subr.bf16.mxu0 %v822_v24 }
  0x66   :  { %745 = vmatpush3.bf16.msra.mxu1 %v829_v30 }
  0x67   :  { %746 = vmatprep.subr.bf16.mxu1 %v975_v1 }
  0x68   :  { %700 = vmatpush3.bf16.msra.mxu0 %v823_v26 }
  0x69   :  { %754 = vmatprep.subr.bf16.mxu0 %v975_v1 }
  0x6a   :  { %747 = vmatpush3.bf16.msra.mxu1 %v830_v31 }
  0x6b   :  { %264 = vmatmul.mubr.bf16.vlgmr.msra.gmra.mrb[0].mxu0 %v89_v19  ;;  %748 = vmatprep.subr.bf16.mxu1 %v975_v1 }
  0x6c   :  { %770 = vmatprep.mubr.msk.bf16.mxu0 %vm976_vm2, %v975_v1  ;;  %755 = vmatpush3.bf16.msra.mxu0 %v832_v33 }
  0x6d   :  { %756 = vmatprep.subr.bf16.mxu0 %v975_v1 }
  0x6e   :  { %749 = vmatpush3.bf16.msra.mxu1 %v831_v32 }
  0x6f   :  { %774 = vmatprep.subr.bf16.mxu1 %v975_v1 }
  0x70   :  { %757 = vmatpush3.bf16.msra.mxu0 %v833_v34 }
  0x71   :  { %758 = vmatprep.subr.bf16.mxu0 %v975_v1 }
  0x74   :  { %759 = vmatpush3.bf16.msra.mxu0 %v834_v35 }
  0x75   :  { %760 = vmatprep.subr.bf16.mxu0 %v975_v1 }
  0x78   :  { %761 = vmatpush3.bf16.msra.mxu0 %v835_v36 }
  0x79   :  { %762 = vmatprep.subr.bf16.mxu0 %v975_v1 }
  0x7c   :  { %763 = vmatpush3.bf16.msra.mxu0 %v836_v37 }
  0x7d   :  { %764 = vmatprep.subr.bf16.mxu0 %v975_v1 }
  0x80   :  { %765 = vmatpush3.bf16.msra.mxu0 %v837_v38 }
  0x81   :  { %766 = vmatprep.subr.bf16.mxu0 %v975_v1 }
  0x84   :  { %767 = vmatpush3.bf16.msra.mxu0 %v838_v51 }
  0x85   :  { %768 = vmatprep.subr.bf16.mxu0 %v975_v1 }
  0x88   :  { %769 = vmatpush3.bf16.msra.mxu0 %v839_v52 }
 0x13e   :  { %v701_v39 = vpop.f32.mrb[0].mxu0 }
 0x13f   :  { %v702_v41 = vpop.f32.mrb[1].mxu0 }
 0x140   :  { %v703_v42 = vadd.f32 %v702_v41, %v701_v39  ;;  %v704_v43 = vpop.f32.mrb[2].mxu0 }
 0x141   :  { %v705_v44 = vpop.f32.mrb[3].mxu0 }
 0x142   :  { %v266_v45 = vadd.f32 %v703_v42, %v640_v40  ;;  %v706_v46 = vadd.f32 %v705_v44, %v704_v43 }
 0x144   :  { %v269_v47 = vadd.f32 %v706_v46, %v640_v40  ;;  %v272_v48 = vmax.f32 %v266_v45, 0.0 }
 0x146   :  { %v273_v49 = vmax.f32 %v269_v47, 0.0 }
 0x148   :  { %v274_v50 = vpack.c.bf16 %v273_v49, %v272_v48 }
 0x14a   :  { %751 = vmatmul.mubr.bf16.vlgmr.msra.gmra.mrb[0].mxu1 %v274_v50 }
 0x14b   :  { %790 = vmatprep.mubr.msk.bf16.mxu1 %vm976_vm2, %v975_v1  ;;  %775 = vmatpush3.bf16.msra.mxu1 %v840_v53 }
 0x14c   :  { %776 = vmatprep.subr.bf16.mxu1 %v975_v1 }
 0x14f   :  { %777 = vmatpush3.bf16.msra.mxu1 %v841_v54 }
 0x150   :  { %778 = vmatprep.subr.bf16.mxu1 %v975_v1 }
 0x153   :  { %779 = vmatpush3.bf16.msra.mxu1 %v842_v55 }
 0x154   :  { %780 = vmatprep.subr.bf16.mxu1 %v975_v1 }
 0x157   :  { %781 = vmatpush3.bf16.msra.mxu1 %v843_v56 }
 0x158   :  { %782 = vmatprep.subr.bf16.mxu1 %v975_v1 }
 0x15b   :  { %783 = vmatpush3.bf16.msra.mxu1 %v844_v57 }
 0x15c   :  { %784 = vmatprep.subr.bf16.mxu1 %v975_v1 }
 0x15f   :  { %785 = vmatpush3.bf16.msra.mxu1 %v845_v58 }
 0x160   :  { %786 = vmatprep.subr.bf16.mxu1 %v975_v1 }
 0x163   :  { %787 = vmatpush3.bf16.msra.mxu1 %v846_v6 }
 0x164   :  { %788 = vmatprep.subr.bf16.mxu1 %v975_v1  ;;  %v676_v1 = vld [vmem:[%s1144_s6] ss:$0 sm:$0xff] }
 0x167   :  { %789 = vmatpush3.bf16.msra.mxu1 %v847_v7 }
 0x21d   :  { %v380_v60 = vpop.f32.mrb[0].mxu1 }
 0x21e   :  { %v381_v61 = vadd.f32 %v657_v59, %v380_v60  ;;  %v752_v62 = vpop.f32.mrb[1].mxu1 }
 0x21f   :  { %v383_v63 = vpop.f32.mrb[2].mxu1 }
 0x220   :  { %v384_v0 = vadd.f32 %v657_v59, %v383_v63  ;;  %v753_v2 = vpop.f32.mrb[3].mxu1  ;;  %v387_v3 = vmax.f32 %v381_v61, 0.0 }
 0x222   :  { %v388_v4 = vmax.f32 %v384_v0, 0.0 }
 0x224   :  { %v389_v5 = vpack.c.bf16 %v388_v4, %v387_v3 }
 0x226   :  { %771 = vmatmul.mubr.bf16.vlgmr.msra.gmra.mrb[4].mxu0 %v389_v5 }
 0x2f9   :  { %v497_v9 = vpop.f32.mrb[4].mxu0 }
 0x2fa   :  { %v498_v10 = vadd.f32 %v667_v8, %v497_v9  ;;  %v772_v11 = vpop.f32.mrb[5].mxu0 }
 0x2fb   :  { %v500_v12 = vpop.f32.mrb[6].mxu0 }
 0x2fc   :  { %v501_v13 = vadd.f32 %v667_v8, %v500_v12  ;;  %v773_v14 = vpop.f32.mrb[7].mxu0  ;;  %v504_v15 = vmax.f32 %v498_v10, 0.0 }
 0x2fe   :  { %v505_v16 = vmax.f32 %v501_v13, 0.0 }
 0x300   :  { %v506_v17 = vpack.c.bf16 %v505_v16, %v504_v15 }
 0x302   :  { %791 = vmatmul.mubr.bf16.vlgmr.msra.gmra.mrb[4].mxu1 %v506_v17 }
 0x3d5   :  { %v612_v18 = vpop.f32.mrb[4].mxu1 }
 0x3d6   :  { %v613_v19 = vadd.f32 %v676_v1, %v612_v18  ;;  %v792_v20 = vpop.f32.mrb[5].mxu1 }
 0x3d7   :  { %v615_v21 = vpop.f32.mrb[6].mxu1 }
 0x3d8   :  { %619 = vst [vmem:[#allocation11] sm:$0xff] %v613_v19  ;;  %v616_v22 = vadd.f32 %v676_v1, %v615_v21  ;;  %v793_v23 = vpop.f32.mrb[7].mxu1 }
 0x3da   :  { %620 = vst [vmem:[#allocation11 + $0x8] sm:$0xff] %v616_v22 }
 0x3db   :  { %947 = shalt.err (!%p944_p8)
}
 0x3dc   :  { %s948_s14 = scalar_lea.hbm %s1145_s7, 256 }
 0x3dd   :  { %p949_p9 = scmp.ne.s32.totalorder %s1145_s7, %s948_s14  ;;  %p952_p10 = scmp.lt.u32.totalorder %s948_s14, %s1145_s7 }
 0x3df   :  { %p954_p11 = pnand %p952_p10, %p949_p9 }
 0x3e1   :  { %957 = shalt.err (!%p954_p11)
}
 0x3e2   :  { %s978_s16 = smov 128   ;;  %s979_s19 = smov 8  }
 0x3e3   :  { %632 = dma.vmem_to_hbm [thread:$0]  %s627_s10, 256, %s1145_s7, [#allocation5], %s978_s16, %s978_s16, %s979_s19  }
 0x3e4   :  { %964 = dma.done.wait [#allocation5], 256  }
 0x3e5   :  { %965 = vsyncadd [#allocation5], 4294967040 }
 0x3e6   :  { %636 = vsyncpa [#allocation4], 1 }
 0x3e7   :  { %637 = vsyncpa [#allocation7], 1 }
 0x3e8   :  { %638 = vsyncpa [#allocation10], 1 }
 0x3e9   :  { %639 = vsyncpa [#allocation5], 1 }

// kernel: tpu_custom_call.1
= control target key start
LH: loop header
LB: loop body
LE: loop exit
PB: predicated region body
PF: predicated region fallthrough
CT: control target
= control target key end

     0   :  { %12 = vsyncpa [#allocation4], 0  ;;  %s1138_s0 = inlined_call_operand.hbm [shape: f32[16,200], index: 0, kind: input, shape index: {}]   ;;  %s1139_s1 = inlined_call_operand.hbm [shape: bf16[256,128], index: 1, kind: input, shape index: {}]   ;;  %s1140_s2 = inlined_call_operand.vmem [shape: f32[1,128], index: 2, kind: input, shape index: {}]   ;;  %s1141_s3 = inlined_call_operand.hbm [shape: bf16[2,128,128], index: 3, kind: input, shape index: {}]   ;;  %s1142_s4 = inlined_call_operand.vmem [shape: f32[2,1,128], index: 4, kind: input, shape index: {}]   ;;  %s1143_s5 = inlined_call_operand.hbm [shape: bf16[128,128], index: 5, kind: input, shape index: {}]   ;;  %s1144_s6 = inlined_call_operand.vmem [shape: f32[1,128], index: 6, kind: input, shape index: {}]   ;;  %s1145_s7 = inlined_call_operand.hbm [shape: f32[16,128], index: 7, kind: output, shape index: {}]  }
   0x1   :  { %13 = vsyncpa [#allocation7], 0 }
   0x2   :  { %14 = vsyncpa [#allocation10], 0 }
   0x3   :  { %15 = vsyncpa [#allocation5], 0  ;;  %s966_s24 = smov [#allocation6]   ;;  %s848_s28 = scalar_lea.hbm %s1139_s1, 2048 }
   0x4   :  { %s33_s25 = sshll.u32 %s966_s24, 4  ;;  %p849_p0 = scmp.ne.s32.totalorder %s1139_s1, %s848_s28  ;;  %s34_s25 = int_to_ptr.vmem [resolvable:$true] %s33_s25 }
   0x5   :  { %p852_p1 = scmp.lt.u32.totalorder %s848_s28, %s1139_s1 }
   0x7   :  { %p854_p2 = pnand %p852_p1, %p849_p0 }
   0x9   :  { %857 = shalt.err (!%p854_p2)
}
   0xa   :  { %s858_s10 = scalar_lea.vmem %s34_s25, 2048  ;;  %p863_p4 = scmp.lt.s32.totalorder %s34_s25, %s34_s25 }
   0xb   :  { %p859_p3 = scmp.ne.s32.totalorder %s34_s25, %s858_s10  ;;  %p864_p5 = scmp.lt.s32.totalorder %s858_s10, %s858_s10 }
   0xd   :  { %p865_p6 = por %p864_p5, %p863_p4 }
   0xf   :  { %p866_p7 = pnand %p865_p6, %p859_p3 }
  0x11   :  { %869 = shalt.err (!%p866_p7)
}
  0x12   :  { %s967_s11 = smov 64   ;;  %s968_s12 = smov 4  }
  0x13   :  { %39 = dma.hbm_to_vmem [thread:$0]  %s1139_s1, 2048, %s34_s25, [#allocation7], %s967_s11, %s967_s11, %s968_s12  }
  0x14   :  { %s969_s15 = smov [#allocation3]   ;;  %s870_s19 = scalar_lea.hbm %s1138_s0, 512 }
  0x15   :  { %s21_s16 = sshll.u32 %s969_s15, 4  ;;  %p871_p8 = scmp.ne.s32.totalorder %s1138_s0, %s870_s19  ;;  %s22_s16 = int_to_ptr.vmem [resolvable:$true] %s21_s16 }
  0x16   :  { %p874_p9 = scmp.lt.u32.totalorder %s870_s19, %s1138_s0 }
  0x18   :  { %p876_p10 = pnand %p874_p9, %p871_p8 }
  0x1a   :  { %879 = shalt.err (!%p876_p10)
}
  0x1b   :  { %s880_s24 = scalar_lea.vmem %s22_s16, 512  ;;  %p885_p12 = scmp.lt.s32.totalorder %s22_s16, %s22_s16 }
  0x1c   :  { %p881_p11 = scmp.ne.s32.totalorder %s22_s16, %s880_s24  ;;  %p886_p13 = scmp.lt.s32.totalorder %s880_s24, %s880_s24 }
  0x1e   :  { %p887_p0 = por %p886_p13, %p885_p12 }
  0x20   :  { %p888_p1 = pnand %p887_p0, %p881_p11 }
  0x22   :  { %891 = shalt.err (!%p888_p1)
}
  0x23   :  { %s970_s1 = smov 256   ;;  %s971_s25 = smov 16  }
  0x24   :  { %27 = dma.hbm_to_vmem [thread:$0]  %s1138_s0, 512, %s22_s16, [#allocation4], %s970_s1, %s970_s1, %s971_s25  }
  0x25   :  { %s972_s28 = smov [#allocation8]   ;;  %s973_s30 = smov [#allocation9]  }
  0x26   :  { %s47_s29 = sshll.u32 %s972_s28, 4  ;;  %s61_s8 = sshll.u32 %s973_s30, 4  ;;  %s48_s29 = int_to_ptr.vmem [resolvable:$true] %s47_s29  ;;  %s1047_s8 = int_to_ptr.vmem [resolvable:$true] %s61_s8 }
  0x27   :  { %s892_s13 = scalar_lea.hbm %s1141_s3, 2048 }
  0x28   :  { %p893_p2 = scmp.ne.s32.totalorder %s1141_s3, %s892_s13  ;;  %p896_p3 = scmp.lt.u32.totalorder %s892_s13, %s1141_s3 }
  0x2a   :  { %p898_p4 = pnand %p896_p3, %p893_p2 }
  0x2c   :  { %901 = shalt.err (!%p898_p4)
}
  0x2d   :  { %s902_s0 = scalar_lea.vmem %s48_s29, 2048  ;;  %p907_p6 = scmp.lt.s32.totalorder %s48_s29, %s48_s29 }
  0x2e   :  { %p903_p5 = scmp.ne.s32.totalorder %s48_s29, %s902_s0  ;;  %p908_p7 = scmp.lt.s32.totalorder %s902_s0, %s902_s0 }
  0x30   :  { %p909_p8 = por %p908_p7, %p907_p6 }
  0x32   :  { %p910_p9 = pnand %p909_p8, %p903_p5 }
  0x34   :  { %913 = shalt.err (!%p910_p9)
}
  0x35   :  { %53 = dma.hbm_to_vmem [thread:$0]  %s1141_s3, 2048, %s48_s29, [#allocation7], %s967_s11, %s967_s11, %s968_s12  }
  0x36   :  { %s914_s22 = scalar_lea.hbm %s1143_s5, 1024 }
  0x37   :  { %p915_p10 = scmp.ne.s32.totalorder %s1143_s5, %s914_s22  ;;  %p918_p11 = scmp.lt.u32.totalorder %s914_s22, %s1143_s5 }
  0x39   :  { %p920_p12 = pnand %p918_p11, %p915_p10 }
  0x3b   :  { %923 = shalt.err (!%p920_p12)
}
  0x3c   :  { %s924_s26 = scalar_lea.vmem %s1047_s8, 1024  ;;  %p929_p0 = scmp.lt.s32.totalorder %s1047_s8, %s1047_s8 }
  0x3d   :  { %p925_p13 = scmp.ne.s32.totalorder %s1047_s8, %s924_s26  ;;  %p930_p1 = scmp.lt.s32.totalorder %s924_s26, %s924_s26 }
  0x3f   :  { %p931_p2 = por %p930_p1, %p929_p0 }
  0x41   :  { %p932_p3 = pnand %p931_p2, %p925_p13 }
  0x43   :  { %935 = shalt.err (!%p932_p3)
}
  0x44   :  { %67 = dma.hbm_to_vmem [thread:$0]  %s1143_s5, 1024, %s1047_s8, [#allocation10], %s967_s11, %s967_s11, %s968_s12  }
  0x45   :  { %958 = dma.done.wait [#allocation4], 512  }
  0x46   :  { %959 = vsyncadd [#allocation4], 4294966784 }
  0x47   :  { %960 = dma.done.wait [#allocation7], 4096  }
  0x48   :  { %961 = vsyncadd [#allocation7], 4294963200 }
  0x49   :  { %962 = dma.done.wait [#allocation10], 1024  }
  0x4a   :  { %963 = vsyncadd [#allocation10], 4294966272  ;;  %vm83_vm0 = vcmask 1048128   ;;  %v974_v0 = vmov 0   ;;  %v975_v1 = vmov 0.0   ;;  %v808_v2 = vld [vmem:[#allocation6 + $0x40] sm:$0xff]  }
  0x4b   :  { %84 = vst.msk [vmem:[#allocation2 + $0x8] sm:$0xff] %vm83_vm0, %v974_v0  ;;  %734 = vmatprep.subr.bf16.mxu1 %v975_v1  ;;  %v809_v3 = vld [vmem:[#allocation6] sm:$0xff]   ;;  %685 = vmatprep.subr.bf16.mxu0 %v808_v2  ;;  %v810_v4 = vld [vmem:[#allocation6 + $0x48] sm:$0xff]   ;;  %v812_v6 = vld [vmem:[#allocation6 + $0x50] sm:$0xff]   ;;  %vm92_vm1 = vcmask 588800   ;;  %vm976_vm2 = vmmov 0  }
  0x4c   :  { %686 = vmatpush3.bf16.msra.mxu0 %v809_v3  ;;  %v811_v5 = vld [vmem:[#allocation6 + $0x8] sm:$0xff]   ;;  %v813_v7 = vld [vmem:[#allocation6 + $0x10] sm:$0xff]   ;;  %v814_v8 = vld [vmem:[#allocation6 + $0x58] sm:$0xff]   ;;  %750 = vmatprep.mubr.msk.bf16.mxu1 %vm976_vm2, %v975_v1  ;;  %s977_s9 = smov [#allocation11]  }
  0x4d   :  { %687 = vmatprep.subr.bf16.mxu0 %v810_v4  ;;  %v815_v9 = vld [vmem:[#allocation6 + $0x18] sm:$0xff]   ;;  %v816_v10 = vld [vmem:[#allocation6 + $0x60] sm:$0xff]   ;;  %v818_v12 = vld [vmem:[#allocation6 + $0x68] sm:$0xff]   ;;  %s626_s10 = sshll.u32 %s977_s9, 4  ;;  %s627_s10 = int_to_ptr.vmem [resolvable:$true] %s626_s10 }
  0x4e   :  { %v817_v11 = vld [vmem:[#allocation6 + $0x20] sm:$0xff]   ;;  %v86_v13 = vld [vmem:[#allocation3 + $0x8] sm:$0xff]  ;;  %v88_v14 = vld [vmem:[#allocation3 + $0x18] sm:$0xff]  ;;  %p941_p5 = scmp.lt.s32.totalorder %s627_s10, %s627_s10 }
  0x4f   :  { %v85_v15 = vld [vmem:[#allocation3] sm:$0xff]  ;;  %v819_v16 = vld [vmem:[#allocation6 + $0x28] sm:$0xff]   ;;  %v90_v17 = vpack.c.bf16 %v88_v14, %v86_v13  ;;  %v87_v18 = vld [vmem:[#allocation3 + $0x10] sm:$0xff] }
  0x50   :  { %688 = vmatpush3.bf16.msra.mxu0 %v811_v5  ;;  %v89_v19 = vpack.c.bf16 %v87_v18, %v85_v15  ;;  %v824_v20 = vld [vmem:[#allocation8] sm:$0xff]   ;;  %v820_v21 = vld [vmem:[#allocation6 + $0x70] sm:$0xff]   ;;  %v825_v22 = vld [vmem:[#allocation8 + $0x8] sm:$0xff]  }
  0x51   :  { %689 = vmatprep.subr.bf16.mxu0 %v812_v6  ;;  %93 = vst.msk [vmem:[#allocation2 + $0x8] sm:$0xff] %vm92_vm1, %v90_v17  ;;  %735 = vmatpush3.bf16.msra.mxu1 %v824_v20  ;;  %v821_v23 = vld [vmem:[#allocation6 + $0x30] sm:$0xff]   ;;  %v822_v24 = vld [vmem:[#allocation6 + $0x78] sm:$0xff]   ;;  %v828_v29 = vld [vmem:[#allocation8 + $0x20] sm:$0xff]  }
  0x52   :  { %736 = vmatprep.subr.bf16.mxu1 %v975_v1  ;;  %v826_v25 = vld [vmem:[#allocation8 + $0x10] sm:$0xff]   ;;  %v823_v26 = vld [vmem:[#allocation6 + $0x38] sm:$0xff]   ;;  %v829_v30 = vld [vmem:[#allocation8 + $0x28] sm:$0xff]  }
  0x53   :  { %v827_v28 = vld [vmem:[#allocation8 + $0x18] sm:$0xff]   ;;  %v830_v31 = vld [vmem:[#allocation8 + $0x30] sm:$0xff]   ;;  %v832_v33 = vld [vmem:[#allocation8 + $0x40] sm:$0xff]  }
  0x54   :  { %690 = vmatpush3.bf16.msra.mxu0 %v813_v7  ;;  %v831_v32 = vld [vmem:[#allocation8 + $0x38] sm:$0xff]   ;;  %v833_v34 = vld [vmem:[#allocation8 + $0x48] sm:$0xff]   ;;  %v834_v35 = vld [vmem:[#allocation8 + $0x50] sm:$0xff]  }
  0x55   :  { %691 = vmatprep.subr.bf16.mxu0 %v814_v8  ;;  %737 = vmatpush3.bf16.msra.mxu1 %v825_v22  ;;  %v835_v36 = vld [vmem:[#allocation8 + $0x58] sm:$0xff]   ;;  %v836_v37 = vld [vmem:[#allocation8 + $0x60] sm:$0xff]   ;;  %v837_v38 = vld [vmem:[#allocation8 + $0x68] sm:$0xff]  }
  0x56   :  { %738 = vmatprep.subr.bf16.mxu1 %v975_v1  ;;  %v640_v40 = vld [vmem:[%s1140_s2] ss:$0 sm:$0xff]  ;;  %v839_v52 = vld [vmem:[#allocation8 + $0x78] sm:$0xff]   ;;  %v840_v53 = vld [vmem:[#allocation9] sm:$0xff]  }
  0x57   :  { %v838_v51 = vld [vmem:[#allocation8 + $0x70] sm:$0xff]   ;;  %v841_v54 = vld [vmem:[#allocation9 + $0x8] sm:$0xff]   ;;  %v843_v56 = vld [vmem:[#allocation9 + $0x18] sm:$0xff]  }
  0x58   :  { %692 = vmatpush3.bf16.msra.mxu0 %v815_v9  ;;  %v95_v27 = vld [vmem:[#allocation2 + $0x8] sm:$0xff]  ;;  %v842_v55 = vld [vmem:[#allocation9 + $0x10] sm:$0xff]   ;;  %v844_v57 = vld [vmem:[#allocation9 + $0x20] sm:$0xff]  }
  0x59   :  { %693 = vmatprep.subr.bf16.mxu0 %v816_v10  ;;  %263 = vmatprep.mubr.bf16.mxu0 %v95_v27  ;;  %v845_v58 = vld [vmem:[#allocation9 + $0x28] sm:$0xff]   ;;  %v657_v59 = vld [vmem:[%s1142_s4] ss:$0 sm:$0xff]  ;;  %v847_v7 = vld [vmem:[#allocation9 + $0x38] sm:$0xff]  }
  0x5a   :  { %739 = vmatpush3.bf16.msra.mxu1 %v826_v25  ;;  %v846_v6 = vld [vmem:[#allocation9 + $0x30] sm:$0xff]  }
  0x5b   :  { %740 = vmatprep.subr.bf16.mxu1 %v975_v1  ;;  %v667_v8 = vld [vmem:[%s1142_s4 + $0x1] ss:$0 sm:$0xff]  ;;  %s936_s4 = scalar_lea.vmem %s627_s10, 256 }
  0x5c   :  { %694 = vmatpush3.bf16.msra.mxu0 %v817_v11  ;;  %p937_p4 = scmp.ne.s32.totalorder %s627_s10, %s936_s4  ;;  %p942_p6 = scmp.lt.s32.totalorder %s936_s4, %s936_s4 }
  0x5d   :  { %695 = vmatprep.subr.bf16.mxu0 %v818_v12 }
  0x5e   :  { %741 = vmatpush3.bf16.msra.mxu1 %v827_v28  ;;  %p943_p7 = por %p942_p6, %p941_p5 }
  0x5f   :  { %742 = vmatprep.subr.bf16.mxu1 %v975_v1 }
  0x60   :  { %696 = vmatpush3.bf16.msra.mxu0 %v819_v16  ;;  %p944_p8 = pnand %p943_p7, %p937_p4 }
  0x61   :  { %697 = vmatprep.subr.bf16.mxu0 %v820_v21 }
  0x62   :  { %743 = vmatpush3.bf16.msra.mxu1 %v828_v29 }
  0x63   :  { %744 = vmatprep.subr.bf16.mxu1 %v975_v1 }
  0x64   :  { %698 = vmatpush3.bf16.msra.mxu0 %v821_v23 }
  0x65   :  { %699 = vmatprep.subr.bf16.mxu0 %v822_v24 }
  0x66   :  { %745 = vmatpush3.bf16.msra.mxu1 %v829_v30 }
  0x67   :  { %746 = vmatprep.subr.bf16.mxu1 %v975_v1 }
  0x68   :  { %700 = vmatpush3.bf16.msra.mxu0 %v823_v26 }
  0x69   :  { %754 = vmatprep.subr.bf16.mxu0 %v975_v1 }
  0x6a   :  { %747 = vmatpush3.bf16.msra.mxu1 %v830_v31 }
  0x6b   :  { %264 = vmatmul.mubr.bf16.vlgmr.msra.gmra.mrb[0].mxu0 %v89_v19  ;;  %748 = vmatprep.subr.bf16.mxu1 %v975_v1 }
  0x6c   :  { %770 = vmatprep.mubr.msk.bf16.mxu0 %vm976_vm2, %v975_v1  ;;  %755 = vmatpush3.bf16.msra.mxu0 %v832_v33 }
  0x6d   :  { %756 = vmatprep.subr.bf16.mxu0 %v975_v1 }
  0x6e   :  { %749 = vmatpush3.bf16.msra.mxu1 %v831_v32 }
  0x6f   :  { %774 = vmatprep.subr.bf16.mxu1 %v975_v1 }
  0x70   :  { %757 = vmatpush3.bf16.msra.mxu0 %v833_v34 }
  0x71   :  { %758 = vmatprep.subr.bf16.mxu0 %v975_v1 }
  0x74   :  { %759 = vmatpush3.bf16.msra.mxu0 %v834_v35 }
  0x75   :  { %760 = vmatprep.subr.bf16.mxu0 %v975_v1 }
  0x78   :  { %761 = vmatpush3.bf16.msra.mxu0 %v835_v36 }
  0x79   :  { %762 = vmatprep.subr.bf16.mxu0 %v975_v1 }
  0x7c   :  { %763 = vmatpush3.bf16.msra.mxu0 %v836_v37 }
  0x7d   :  { %764 = vmatprep.subr.bf16.mxu0 %v975_v1 }
  0x80   :  { %765 = vmatpush3.bf16.msra.mxu0 %v837_v38 }
  0x81   :  { %766 = vmatprep.subr.bf16.mxu0 %v975_v1 }
  0x84   :  { %767 = vmatpush3.bf16.msra.mxu0 %v838_v51 }
  0x85   :  { %768 = vmatprep.subr.bf16.mxu0 %v975_v1 }
  0x88   :  { %769 = vmatpush3.bf16.msra.mxu0 %v839_v52 }
 0x13e   :  { %v701_v39 = vpop.f32.mrb[0].mxu0 }
 0x13f   :  { %v702_v41 = vpop.f32.mrb[1].mxu0 }
 0x140   :  { %v703_v42 = vadd.f32 %v702_v41, %v701_v39  ;;  %v704_v43 = vpop.f32.mrb[2].mxu0 }
 0x141   :  { %v705_v44 = vpop.f32.mrb[3].mxu0 }
 0x142   :  { %v266_v45 = vadd.f32 %v703_v42, %v640_v40  ;;  %v706_v46 = vadd.f32 %v705_v44, %v704_v43 }
 0x144   :  { %v269_v47 = vadd.f32 %v706_v46, %v640_v40  ;;  %v272_v48 = vmax.f32 %v266_v45, 0.0 }
 0x146   :  { %v273_v49 = vmax.f32 %v269_v47, 0.0 }
 0x148   :  { %v274_v50 = vpack.c.bf16 %v273_v49, %v272_v48 }
 0x14a   :  { %751 = vmatmul.mubr.bf16.vlgmr.msra.gmra.mrb[0].mxu1 %v274_v50 }
 0x14b   :  { %790 = vmatprep.mubr.msk.bf16.mxu1 %vm976_vm2, %v975_v1  ;;  %775 = vmatpush3.bf16.msra.mxu1 %v840_v53 }
 0x14c   :  { %776 = vmatprep.subr.bf16.mxu1 %v975_v1 }
 0x14f   :  { %777 = vmatpush3.bf16.msra.mxu1 %v841_v54 }
 0x150   :  { %778 = vmatprep.subr.bf16.mxu1 %v975_v1 }
 0x153   :  { %779 = vmatpush3.bf16.msra.mxu1 %v842_v55 }
 0x154   :  { %780 = vmatprep.subr.bf16.mxu1 %v975_v1 }
 0x157   :  { %781 = vmatpush3.bf16.msra.mxu1 %v843_v56 }
 0x158   :  { %782 = vmatprep.subr.bf16.mxu1 %v975_v1 }
 0x15b   :  { %783 = vmatpush3.bf16.msra.mxu1 %v844_v57 }
 0x15c   :  { %784 = vmatprep.subr.bf16.mxu1 %v975_v1 }
 0x15f   :  { %785 = vmatpush3.bf16.msra.mxu1 %v845_v58 }
 0x160   :  { %786 = vmatprep.subr.bf16.mxu1 %v975_v1 }
 0x163   :  { %787 = vmatpush3.bf16.msra.mxu1 %v846_v6 }
 0x164   :  { %788 = vmatprep.subr.bf16.mxu1 %v975_v1  ;;  %v676_v1 = vld [vmem:[%s1144_s6] ss:$0 sm:$0xff] }
 0x167   :  { %789 = vmatpush3.bf16.msra.mxu1 %v847_v7 }
 0x21d   :  { %v380_v60 = vpop.f32.mrb[0].mxu1 }
 0x21e   :  { %v381_v61 = vadd.f32 %v657_v59, %v380_v60  ;;  %v752_v62 = vpop.f32.mrb[1].mxu1 }
 0x21f   :  { %v383_v63 = vpop.f32.mrb[2].mxu1 }
 0x220   :  { %v384_v0 = vadd.f32 %v657_v59, %v383_v63  ;;  %v753_v2 = vpop.f32.mrb[3].mxu1  ;;  %v387_v3 = vmax.f32 %v381_v61, 0.0 }
 0x222   :  { %v388_v4 = vmax.f32 %v384_v0, 0.0 }
 0x224   :  { %v389_v5 = vpack.c.bf16 %v388_v4, %v387_v3 }
 0x226   :  { %771 = vmatmul.mubr.bf16.vlgmr.msra.gmra.mrb[4].mxu0 %v389_v5 }
 0x2f9   :  { %v497_v9 = vpop.f32.mrb[4].mxu0 }
 0x2fa   :  { %v498_v10 = vadd.f32 %v667_v8, %v497_v9  ;;  %v772_v11 = vpop.f32.mrb[5].mxu0 }
 0x2fb   :  { %v500_v12 = vpop.f32.mrb[6].mxu0 }
 0x2fc   :  { %v501_v13 = vadd.f32 %v667_v8, %v500_v12  ;;  %v773_v14 = vpop.f32.mrb[7].mxu0  ;;  %v504_v15 = vmax.f32 %v498_v10, 0.0 }
 0x2fe   :  { %v505_v16 = vmax.f32 %v501_v13, 0.0 }
 0x300   :  { %v506_v17 = vpack.c.bf16 %v505_v16, %v504_v15 }
 0x302   :  { %791 = vmatmul.mubr.bf16.vlgmr.msra.gmra.mrb[4].mxu1 %v506_v17 }
 0x3d5   :  { %v612_v18 = vpop.f32.mrb[4].mxu1 }
 0x3d6   :  { %v613_v19 = vadd.f32 %v676_v1, %v612_v18  ;;  %v792_v20 = vpop.f32.mrb[5].mxu1 }
 0x3d7   :  { %v615_v21 = vpop.f32.mrb[6].mxu1 }
 0x3d8   :  { %619 = vst [vmem:[#allocation11] sm:$0xff] %v613_v19  ;;  %v616_v22 = vadd.f32 %v676_v1, %v615_v21  ;;  %v793_v23 = vpop.f32.mrb[7].mxu1 }
 0x3da   :  { %620 = vst [vmem:[#allocation11 + $0x8] sm:$0xff] %v616_v22 }
 0x3db   :  { %947 = shalt.err (!%p944_p8)
}
 0x3dc   :  { %s948_s14 = scalar_lea.hbm %s1145_s7, 256 }
 0x3dd   :  { %p949_p9 = scmp.ne.s32.totalorder %s1145_s7, %s948_s14  ;;  %p952_p10 = scmp.lt.u32.totalorder %s948_s14, %s1145_s7 }
 0x3df   :  { %p954_p11 = pnand %p952_p10, %p949_p9 }
 0x3e1   :  { %957 = shalt.err (!%p954_p11)
}
 0x3e2   :  { %s978_s16 = smov 128   ;;  %s979_s19 = smov 8  }
 0x3e3   :  { %632 = dma.vmem_to_hbm [thread:$0]  %s627_s10, 256, %s1145_s7, [#allocation5], %s978_s16, %s978_s16, %s979_s19  }
 0x3e4   :  { %964 = dma.done.wait [#allocation5], 256  }
 0x3e5   :  { %965 = vsyncadd [#allocation5], 4294967040 }
 0x3e6   :  { %636 = vsyncpa [#allocation4], 1 }
 0x3e7   :  { %637 = vsyncpa [#allocation7], 1 }
 0x3e8   :  { %638 = vsyncpa [#allocation10], 1 }
 0x3e9   :  { %639 = vsyncpa [#allocation5], 1 }

</bundles_post_ra>
